<compile_context>
chip_gen: v6e
topology: v6e:2x2x1
jax: 0.10.0
libtpu: 0.0.40
codegen_flags: <defaults>
</compile_context>

<pallas_src>
import jax
import jax.numpy as jnp
from jax import lax
from jax.experimental import pallas as pl
from jax.experimental.pallas import tpu as pltpu

# ---- hyperparameters implied by the module constants (kept small) ----------
EMBEDDING_DIM = 32
HIDDEN_SIZE = 32
OUTPUT_SIZE = 2
LSTM_DROPOUT = 0.5      # identity at inference
VOCAB_SIZE = 16
BATCH = 2
SEQ_LEN = 8


def lstm_nold_kernel(tok_ref, len_ref, table_ref, whh_ref, w12_ref, b12_ref,
                     out_ref):
    """Fused forward: embedding + input-proj (one-hot matmul), LSTM recurrence,
    fused MLP head.

    tok_ref   : [T*B, 1] int32  token ids, TIME-major flatten (row = t*B + b)
    len_ref   : [B, 1]   int32  valid lengths
    table_ref : [V, 4H]  f32    embeddings @ W_ih + (b_ih + b_hh)  (order i,f,g,o)
    whh_ref   : [H, 4H]  f32    hidden-hidden weights (pre-transposed, h @ W)
    w12_ref   : [H, OUT] f32    fused head weights  (w1 @ w2)
    b12_ref   : [1, OUT] f32    fused head bias     (b1 @ w2 + b2)
    out_ref   : [B, OUT] f32
    """
    TB = tok_ref.shape[0]
    V = table_ref.shape[0]
    H = whh_ref.shape[0]
    B = len_ref.shape[0]
    T = TB // B

    # ---- embedding lookup + input projection, hoisted out of the recurrence.
    # one-hot(tokens) @ (embeddings @ W_ih + b)  ==  embeddings[tokens] @ W_ih + b
    tok_col = tok_ref[...]                                        # [T*B, 1] int32
    iota_v = lax.broadcasted_iota(jnp.int32, (TB, V), 1)          # [T*B, V]
    onehot = (iota_v == tok_col).astype(jnp.float32)              # [T*B, V]
    xw_all = jnp.dot(onehot, table_ref[...],
                     preferred_element_type=jnp.float32)          # [T*B, 4H]

    lens = len_ref[...]                                           # [B, 1] int32
    whh = whh_ref[...]                                            # [H, 4H]

    # ---- LSTM recurrence: state in registers, statically unrolled (T small).
    h = jnp.zeros((B, H), jnp.float32)
    c = jnp.zeros((B, H), jnp.float32)
    for t in range(T):
        # time-major flatten -> step t's rows are a contiguous static slice.
        gates = xw_all[t * B:(t + 1) * B, :] + jnp.dot(
            h, whh, preferred_element_type=jnp.float32)           # [B, 4H]

        # Full-width transcendentals (one vreg each), then lane-slice gate blocks.
        sig = jax.nn.sigmoid(gates)                               # i, f, o source
        tnh = jnp.tanh(gates)                                     # g source
        i_g = sig[:, 0 * H:1 * H]
        f_g = sig[:, 1 * H:2 * H]
        g_g = tnh[:, 2 * H:3 * H]
        o_g = sig[:, 3 * H:4 * H]

        c_new = f_g * c + i_g * g_g
        h_new = o_g * jnp.tanh(c_new)

        # pack_padded_sequence semantics: only advance state while t < length,
        # so the final h is the hidden state at each sequence's last valid step.
        valid = t < lens                                          # [B, 1] bool
        c = jnp.where(valid, c_new, c)
        h = jnp.where(valid, h_new, h)

    # ---- head: linear1 -> LeakyReLU(True) (slope==1.0, identity) ->
    #            Dropout (identity at inference) -> linear2, fused to one matmul.
    out_ref[...] = (jnp.dot(h, w12_ref[...],
                            preferred_element_type=jnp.float32) + b12_ref[...])


def prepare_params(params):
    """Offline (one-time) parameter fusion — keeps the forward path to a single
    pallas_call with no extra XLA ops."""
    table = params["embeddings"] @ params["wih"] + params["b"]    # [V, 4H]
    w12 = params["w1"] @ params["w2"]                             # [H, OUT]
    b12 = params["b1"] @ params["w2"] + params["b2"]              # [1, OUT]
    return dict(table=table, whh=params["whh"], w12=w12, b12=b12)


def lstm_nold_forward(x_tokens, x_lengths, fused):
    """One Pallas call; wrapper does only tiny metadata/layout ops on int32."""
    B, T = x_tokens.shape
    # time-major flatten: row = t*B + b  -> per-step contiguous rows in-kernel.
    tok = x_tokens.astype(jnp.int32).T.reshape(T * B, 1)
    lens = x_lengths.astype(jnp.int32).reshape(B, 1)

    vspec = pl.BlockSpec(memory_space=pltpu.MemorySpace.VMEM)
    return pl.pallas_call(
        lstm_nold_kernel,
        out_shape=jax.ShapeDtypeStruct((B, OUTPUT_SIZE), jnp.float32),
        in_specs=[vspec] * 6,
        out_specs=vspec,
    )(tok, lens, fused["table"], fused["whh"], fused["w12"], fused["b12"])


def init_params(key):
    ks = jax.random.split(key, 8)
    H, E, O, V = HIDDEN_SIZE, EMBEDDING_DIM, OUTPUT_SIZE, VOCAB_SIZE
    scale = 0.1
    emb = scale * jax.random.normal(ks[0], (V, E), jnp.float32)
    emb = emb.at[0].set(0.0)                                      # padding_idx=0
    # PyTorch LSTM: W_ih [4H, E], W_hh [4H, H]; pre-transposed for x @ W.
    wih = scale * jax.random.normal(ks[1], (E, 4 * H), jnp.float32)
    whh = scale * jax.random.normal(ks[2], (H, 4 * H), jnp.float32)
    b_ih = scale * jax.random.normal(ks[3], (1, 4 * H), jnp.float32)
    b_hh = scale * jax.random.normal(ks[4], (1, 4 * H), jnp.float32)
    w1 = scale * jax.random.normal(ks[5], (H, H), jnp.float32)
    b1 = scale * jax.random.normal(ks[6], (1, H), jnp.float32)
    w2 = scale * jax.random.normal(ks[7], (H, O), jnp.float32)
    b2 = jnp.zeros((1, O), jnp.float32)
    return dict(embeddings=emb, wih=wih, whh=whh, b=b_ih + b_hh,
                w1=w1, b1=b1, w2=w2, b2=b2)


def reference_forward(x_tokens, x_lengths, params):
    """Pure-JAX reference of the same semantics (unfused, for validation)."""
    H = HIDDEN_SIZE
    embedded = jnp.take(params["embeddings"], x_tokens, axis=0)   # [B, T, E]
    B, T, _ = embedded.shape
    h = jnp.zeros((B, H), jnp.float32)
    c = jnp.zeros((B, H), jnp.float32)
    for t in range(T):
        x_t = embedded[:, t, :]
        gates = x_t @ params["wih"] + h @ params["whh"] + params["b"]
        i_g = jax.nn.sigmoid(gates[:, 0 * H:1 * H])
        f_g = jax.nn.sigmoid(gates[:, 1 * H:2 * H])
        g_g = jnp.tanh(gates[:, 2 * H:3 * H])
        o_g = jax.nn.sigmoid(gates[:, 3 * H:4 * H])
        c_new = f_g * c + i_g * g_g
        h_new = o_g * jnp.tanh(c_new)
        valid = (t < x_lengths)[:, None]
        c = jnp.where(valid, c_new, c)
        h = jnp.where(valid, h_new, h)
    s1 = h @ params["w1"] + params["b1"]
    act = jnp.where(s1 >= 0, s1, 1.0 * s1)        # LeakyReLU(True): slope == 1.0
    return act @ params["w2"] + params["b2"]      # Dropout: identity at inference


if __name__ == "__main__":
    key = jax.random.PRNGKey(0)
    pkey, tkey = jax.random.split(key)
    params = init_params(pkey)
    fused = prepare_params(params)

    # Token ids in [1, VOCAB); pad (id 0) everything past each sequence length.
    tokens = jax.random.randint(tkey, (BATCH, SEQ_LEN), 1, VOCAB_SIZE,
                                dtype=jnp.int32)
    x_lengths = jnp.array([SEQ_LEN, 5], dtype=jnp.int32)   # descending (packed)
    pos = jnp.arange(SEQ_LEN)[None, :]
    tokens = jnp.where(pos < x_lengths[:, None], tokens, 0)

    out = lstm_nold_forward(tokens, x_lengths, fused)
    out = jax.block_until_ready(out)

    ref = reference_forward(tokens, x_lengths, params)
    assert out.shape == (BATCH, OUTPUT_SIZE)
    assert jnp.allclose(out, ref, rtol=2e-2, atol=2e-3), (out, ref)
    print("KERNEL_OK")
</pallas_src>

<mosaic_0001>
module attributes {stable_mosaic.version = 11 : i64} {
  func.func @lstm_nold_kernel(%arg0: memref<16x1xi32, #tpu.memory_space<vmem>>, %arg1: memref<2x1xi32, #tpu.memory_space<vmem>>, %arg2: memref<16x128xf32, #tpu.memory_space<vmem>>, %arg3: memref<32x128xf32, #tpu.memory_space<vmem>>, %arg4: memref<32x2xf32, #tpu.memory_space<vmem>>, %arg5: memref<1x2xf32, #tpu.memory_space<vmem>>, %arg6: memref<2x2xf32, #tpu.memory_space<vmem>>) attributes {dimension_semantics = [], scalar_prefetch = 0 : i64, scratch_operands = 0 : i64, tpu.core_type = #tpu.core_type<tc>} {
    %c0 = arith.constant 0 : index
    %c0_0 = arith.constant 0 : index
    %0 = vector.load %arg0[%c0, %c0_0] : memref<16x1xi32, #tpu.memory_space<vmem>>, vector<16x1xi32>
    %1 = tpu.iota {dimensions = array<i32: 1>} : vector<16x16xi32>
    %2 = vector.broadcast %0 : vector<16x1xi32> to vector<16x16xi32>
    %3 = arith.cmpi eq, %1, %2 : vector<16x16xi32>
    %4 = arith.extui %3 : vector<16x16xi1> to vector<16x16xi32>
    %5 = arith.sitofp %4 : vector<16x16xi32> to vector<16x16xf32>
    %c0_1 = arith.constant 0 : index
    %c0_2 = arith.constant 0 : index
    %6 = vector.load %arg2[%c0_1, %c0_2] : memref<16x128xf32, #tpu.memory_space<vmem>>, vector<16x128xf32>
    %cst = arith.constant dense<0.000000e+00> : vector<16x128xf32>
    %7 = tpu.matmul %5, %6, %cst {dimension_numbers = #tpu.dot_dimension_numbers<[1], [0], [0], [1], [0, 0, 1, 1], [], []>} : vector<16x16xf32>, vector<16x128xf32>, vector<16x128xf32> -> vector<16x128xf32>
    %c0_3 = arith.constant 0 : index
    %c0_4 = arith.constant 0 : index
    %8 = vector.load %arg1[%c0_3, %c0_4] : memref<2x1xi32, #tpu.memory_space<vmem>>, vector<2x1xi32>
    %c0_5 = arith.constant 0 : index
    %c0_6 = arith.constant 0 : index
    %9 = vector.load %arg3[%c0_5, %c0_6] : memref<32x128xf32, #tpu.memory_space<vmem>>, vector<32x128xf32>
    %cst_7 = arith.constant 0.000000e+00 : f32
    %10 = vector.broadcast %cst_7 : f32 to vector<2x32xf32>
    %cst_8 = arith.constant 0.000000e+00 : f32
    %11 = vector.broadcast %cst_8 : f32 to vector<2x32xf32>
    %12 = vector.extract_strided_slice %7 {offsets = [0, 0], sizes = [2, 128], strides = [1, 1]} : vector<16x128xf32> to vector<2x128xf32>
    %cst_9 = arith.constant dense<0.000000e+00> : vector<2x128xf32>
    %13 = tpu.matmul %10, %9, %cst_9 {dimension_numbers = #tpu.dot_dimension_numbers<[1], [0], [0], [1], [0, 0, 1, 1], [], []>} : vector<2x32xf32>, vector<32x128xf32>, vector<2x128xf32> -> vector<2x128xf32>
    %14 = arith.addf %12, %13 : vector<2x128xf32>
    %15 = arith.negf %14 : vector<2x128xf32>
    %16 = math.exp %15 : vector<2x128xf32>
    %cst_10 = arith.constant 1.000000e+00 : f32
    %17 = vector.broadcast %cst_10 : f32 to vector<2x128xf32>
    %18 = arith.addf %17, %16 : vector<2x128xf32>
    %19 = arith.divf %17, %18 : vector<2x128xf32>
    %20 = math.tanh %14 : vector<2x128xf32>
    %21 = vector.extract_strided_slice %19 {offsets = [0, 0], sizes = [2, 32], strides = [1, 1]} : vector<2x128xf32> to vector<2x32xf32>
    %22 = vector.extract_strided_slice %19 {offsets = [0, 32], sizes = [2, 32], strides = [1, 1]} : vector<2x128xf32> to vector<2x32xf32>
    %23 = vector.extract_strided_slice %20 {offsets = [0, 64], sizes = [2, 32], strides = [1, 1]} : vector<2x128xf32> to vector<2x32xf32>
    %24 = vector.extract_strided_slice %19 {offsets = [0, 96], sizes = [2, 32], strides = [1, 1]} : vector<2x128xf32> to vector<2x32xf32>
    %25 = arith.mulf %22, %11 : vector<2x32xf32>
    %26 = arith.mulf %21, %23 : vector<2x32xf32>
    %27 = arith.addf %25, %26 : vector<2x32xf32>
    %28 = math.tanh %27 : vector<2x32xf32>
    %29 = arith.mulf %24, %28 : vector<2x32xf32>
    %c0_i32 = arith.constant 0 : i32
    %30 = vector.broadcast %c0_i32 : i32 to vector<2x1xi32>
    %31 = arith.cmpi sgt, %8, %30 : vector<2x1xi32>
    %32 = vector.shape_cast %31 : vector<2x1xi1> to vector<2x1xi1>
    %33 = vector.broadcast %32 : vector<2x1xi1> to vector<2x32xi1>
    %34 = arith.select %33, %27, %11 : vector<2x32xi1>, vector<2x32xf32>
    %35 = vector.shape_cast %31 : vector<2x1xi1> to vector<2x1xi1>
    %36 = vector.broadcast %35 : vector<2x1xi1> to vector<2x32xi1>
    %37 = arith.select %36, %29, %10 : vector<2x32xi1>, vector<2x32xf32>
    %38 = vector.extract_strided_slice %7 {offsets = [2, 0], sizes = [2, 128], strides = [1, 1]} : vector<16x128xf32> to vector<2x128xf32>
    %cst_11 = arith.constant dense<0.000000e+00> : vector<2x128xf32>
    %39 = tpu.matmul %37, %9, %cst_11 {dimension_numbers = #tpu.dot_dimension_numbers<[1], [0], [0], [1], [0, 0, 1, 1], [], []>} : vector<2x32xf32>, vector<32x128xf32>, vector<2x128xf32> -> vector<2x128xf32>
    %40 = arith.addf %38, %39 : vector<2x128xf32>
    %41 = arith.negf %40 : vector<2x128xf32>
    %42 = math.exp %41 : vector<2x128xf32>
    %cst_12 = arith.constant 1.000000e+00 : f32
    %43 = vector.broadcast %cst_12 : f32 to vector<2x128xf32>
    %44 = arith.addf %43, %42 : vector<2x128xf32>
    %45 = arith.divf %43, %44 : vector<2x128xf32>
    %46 = math.tanh %40 : vector<2x128xf32>
    %47 = vector.extract_strided_slice %45 {offsets = [0, 0], sizes = [2, 32], strides = [1, 1]} : vector<2x128xf32> to vector<2x32xf32>
    %48 = vector.extract_strided_slice %45 {offsets = [0, 32], sizes = [2, 32], strides = [1, 1]} : vector<2x128xf32> to vector<2x32xf32>
    %49 = vector.extract_strided_slice %46 {offsets = [0, 64], sizes = [2, 32], strides = [1, 1]} : vector<2x128xf32> to vector<2x32xf32>
    %50 = vector.extract_strided_slice %45 {offsets = [0, 96], sizes = [2, 32], strides = [1, 1]} : vector<2x128xf32> to vector<2x32xf32>
    %51 = arith.mulf %48, %34 : vector<2x32xf32>
    %52 = arith.mulf %47, %49 : vector<2x32xf32>
    %53 = arith.addf %51, %52 : vector<2x32xf32>
    %54 = math.tanh %53 : vector<2x32xf32>
    %55 = arith.mulf %50, %54 : vector<2x32xf32>
    %c1_i32 = arith.constant 1 : i32
    %56 = vector.broadcast %c1_i32 : i32 to vector<2x1xi32>
    %57 = arith.cmpi sgt, %8, %56 : vector<2x1xi32>
    %58 = vector.shape_cast %57 : vector<2x1xi1> to vector<2x1xi1>
    %59 = vector.broadcast %58 : vector<2x1xi1> to vector<2x32xi1>
    %60 = arith.select %59, %53, %34 : vector<2x32xi1>, vector<2x32xf32>
    %61 = vector.shape_cast %57 : vector<2x1xi1> to vector<2x1xi1>
    %62 = vector.broadcast %61 : vector<2x1xi1> to vector<2x32xi1>
    %63 = arith.select %62, %55, %37 : vector<2x32xi1>, vector<2x32xf32>
    %64 = vector.extract_strided_slice %7 {offsets = [4, 0], sizes = [2, 128], strides = [1, 1]} : vector<16x128xf32> to vector<2x128xf32>
    %cst_13 = arith.constant dense<0.000000e+00> : vector<2x128xf32>
    %65 = tpu.matmul %63, %9, %cst_13 {dimension_numbers = #tpu.dot_dimension_numbers<[1], [0], [0], [1], [0, 0, 1, 1], [], []>} : vector<2x32xf32>, vector<32x128xf32>, vector<2x128xf32> -> vector<2x128xf32>
    %66 = arith.addf %64, %65 : vector<2x128xf32>
    %67 = arith.negf %66 : vector<2x128xf32>
    %68 = math.exp %67 : vector<2x128xf32>
    %cst_14 = arith.constant 1.000000e+00 : f32
    %69 = vector.broadcast %cst_14 : f32 to vector<2x128xf32>
    %70 = arith.addf %69, %68 : vector<2x128xf32>
    %71 = arith.divf %69, %70 : vector<2x128xf32>
    %72 = math.tanh %66 : vector<2x128xf32>
    %73 = vector.extract_strided_slice %71 {offsets = [0, 0], sizes = [2, 32], strides = [1, 1]} : vector<2x128xf32> to vector<2x32xf32>
    %74 = vector.extract_strided_slice %71 {offsets = [0, 32], sizes = [2, 32], strides = [1, 1]} : vector<2x128xf32> to vector<2x32xf32>
    %75 = vector.extract_strided_slice %72 {offsets = [0, 64], sizes = [2, 32], strides = [1, 1]} : vector<2x128xf32> to vector<2x32xf32>
    %76 = vector.extract_strided_slice %71 {offsets = [0, 96], sizes = [2, 32], strides = [1, 1]} : vector<2x128xf32> to vector<2x32xf32>
    %77 = arith.mulf %74, %60 : vector<2x32xf32>
    %78 = arith.mulf %73, %75 : vector<2x32xf32>
    %79 = arith.addf %77, %78 : vector<2x32xf32>
    %80 = math.tanh %79 : vector<2x32xf32>
    %81 = arith.mulf %76, %80 : vector<2x32xf32>
    %c2_i32 = arith.constant 2 : i32
    %82 = vector.broadcast %c2_i32 : i32 to vector<2x1xi32>
    %83 = arith.cmpi sgt, %8, %82 : vector<2x1xi32>
    %84 = vector.shape_cast %83 : vector<2x1xi1> to vector<2x1xi1>
    %85 = vector.broadcast %84 : vector<2x1xi1> to vector<2x32xi1>
    %86 = arith.select %85, %79, %60 : vector<2x32xi1>, vector<2x32xf32>
    %87 = vector.shape_cast %83 : vector<2x1xi1> to vector<2x1xi1>
    %88 = vector.broadcast %87 : vector<2x1xi1> to vector<2x32xi1>
    %89 = arith.select %88, %81, %63 : vector<2x32xi1>, vector<2x32xf32>
    %90 = vector.extract_strided_slice %7 {offsets = [6, 0], sizes = [2, 128], strides = [1, 1]} : vector<16x128xf32> to vector<2x128xf32>
    %cst_15 = arith.constant dense<0.000000e+00> : vector<2x128xf32>
    %91 = tpu.matmul %89, %9, %cst_15 {dimension_numbers = #tpu.dot_dimension_numbers<[1], [0], [0], [1], [0, 0, 1, 1], [], []>} : vector<2x32xf32>, vector<32x128xf32>, vector<2x128xf32> -> vector<2x128xf32>
    %92 = arith.addf %90, %91 : vector<2x128xf32>
    %93 = arith.negf %92 : vector<2x128xf32>
    %94 = math.exp %93 : vector<2x128xf32>
    %cst_16 = arith.constant 1.000000e+00 : f32
    %95 = vector.broadcast %cst_16 : f32 to vector<2x128xf32>
    %96 = arith.addf %95, %94 : vector<2x128xf32>
    %97 = arith.divf %95, %96 : vector<2x128xf32>
    %98 = math.tanh %92 : vector<2x128xf32>
    %99 = vector.extract_strided_slice %97 {offsets = [0, 0], sizes = [2, 32], strides = [1, 1]} : vector<2x128xf32> to vector<2x32xf32>
    %100 = vector.extract_strided_slice %97 {offsets = [0, 32], sizes = [2, 32], strides = [1, 1]} : vector<2x128xf32> to vector<2x32xf32>
    %101 = vector.extract_strided_slice %98 {offsets = [0, 64], sizes = [2, 32], strides = [1, 1]} : vector<2x128xf32> to vector<2x32xf32>
    %102 = vector.extract_strided_slice %97 {offsets = [0, 96], sizes = [2, 32], strides = [1, 1]} : vector<2x128xf32> to vector<2x32xf32>
    %103 = arith.mulf %100, %86 : vector<2x32xf32>
    %104 = arith.mulf %99, %101 : vector<2x32xf32>
    %105 = arith.addf %103, %104 : vector<2x32xf32>
    %106 = math.tanh %105 : vector<2x32xf32>
    %107 = arith.mulf %102, %106 : vector<2x32xf32>
    %c3_i32 = arith.constant 3 : i32
    %108 = vector.broadcast %c3_i32 : i32 to vector<2x1xi32>
    %109 = arith.cmpi sgt, %8, %108 : vector<2x1xi32>
    %110 = vector.shape_cast %109 : vector<2x1xi1> to vector<2x1xi1>
    %111 = vector.broadcast %110 : vector<2x1xi1> to vector<2x32xi1>
    %112 = arith.select %111, %105, %86 : vector<2x32xi1>, vector<2x32xf32>
    %113 = vector.shape_cast %109 : vector<2x1xi1> to vector<2x1xi1>
    %114 = vector.broadcast %113 : vector<2x1xi1> to vector<2x32xi1>
    %115 = arith.select %114, %107, %89 : vector<2x32xi1>, vector<2x32xf32>
    %116 = vector.extract_strided_slice %7 {offsets = [8, 0], sizes = [2, 128], strides = [1, 1]} : vector<16x128xf32> to vector<2x128xf32>
    %cst_17 = arith.constant dense<0.000000e+00> : vector<2x128xf32>
    %117 = tpu.matmul %115, %9, %cst_17 {dimension_numbers = #tpu.dot_dimension_numbers<[1], [0], [0], [1], [0, 0, 1, 1], [], []>} : vector<2x32xf32>, vector<32x128xf32>, vector<2x128xf32> -> vector<2x128xf32>
    %118 = arith.addf %116, %117 : vector<2x128xf32>
    %119 = arith.negf %118 : vector<2x128xf32>
    %120 = math.exp %119 : vector<2x128xf32>
    %cst_18 = arith.constant 1.000000e+00 : f32
    %121 = vector.broadcast %cst_18 : f32 to vector<2x128xf32>
    %122 = arith.addf %121, %120 : vector<2x128xf32>
    %123 = arith.divf %121, %122 : vector<2x128xf32>
    %124 = math.tanh %118 : vector<2x128xf32>
    %125 = vector.extract_strided_slice %123 {offsets = [0, 0], sizes = [2, 32], strides = [1, 1]} : vector<2x128xf32> to vector<2x32xf32>
    %126 = vector.extract_strided_slice %123 {offsets = [0, 32], sizes = [2, 32], strides = [1, 1]} : vector<2x128xf32> to vector<2x32xf32>
    %127 = vector.extract_strided_slice %124 {offsets = [0, 64], sizes = [2, 32], strides = [1, 1]} : vector<2x128xf32> to vector<2x32xf32>
    %128 = vector.extract_strided_slice %123 {offsets = [0, 96], sizes = [2, 32], strides = [1, 1]} : vector<2x128xf32> to vector<2x32xf32>
    %129 = arith.mulf %126, %112 : vector<2x32xf32>
    %130 = arith.mulf %125, %127 : vector<2x32xf32>
    %131 = arith.addf %129, %130 : vector<2x32xf32>
    %132 = math.tanh %131 : vector<2x32xf32>
    %133 = arith.mulf %128, %132 : vector<2x32xf32>
    %c4_i32 = arith.constant 4 : i32
    %134 = vector.broadcast %c4_i32 : i32 to vector<2x1xi32>
    %135 = arith.cmpi sgt, %8, %134 : vector<2x1xi32>
    %136 = vector.shape_cast %135 : vector<2x1xi1> to vector<2x1xi1>
    %137 = vector.broadcast %136 : vector<2x1xi1> to vector<2x32xi1>
    %138 = arith.select %137, %131, %112 : vector<2x32xi1>, vector<2x32xf32>
    %139 = vector.shape_cast %135 : vector<2x1xi1> to vector<2x1xi1>
    %140 = vector.broadcast %139 : vector<2x1xi1> to vector<2x32xi1>
    %141 = arith.select %140, %133, %115 : vector<2x32xi1>, vector<2x32xf32>
    %142 = vector.extract_strided_slice %7 {offsets = [10, 0], sizes = [2, 128], strides = [1, 1]} : vector<16x128xf32> to vector<2x128xf32>
    %cst_19 = arith.constant dense<0.000000e+00> : vector<2x128xf32>
    %143 = tpu.matmul %141, %9, %cst_19 {dimension_numbers = #tpu.dot_dimension_numbers<[1], [0], [0], [1], [0, 0, 1, 1], [], []>} : vector<2x32xf32>, vector<32x128xf32>, vector<2x128xf32> -> vector<2x128xf32>
    %144 = arith.addf %142, %143 : vector<2x128xf32>
    %145 = arith.negf %144 : vector<2x128xf32>
    %146 = math.exp %145 : vector<2x128xf32>
    %cst_20 = arith.constant 1.000000e+00 : f32
    %147 = vector.broadcast %cst_20 : f32 to vector<2x128xf32>
    %148 = arith.addf %147, %146 : vector<2x128xf32>
    %149 = arith.divf %147, %148 : vector<2x128xf32>
    %150 = math.tanh %144 : vector<2x128xf32>
    %151 = vector.extract_strided_slice %149 {offsets = [0, 0], sizes = [2, 32], strides = [1, 1]} : vector<2x128xf32> to vector<2x32xf32>
    %152 = vector.extract_strided_slice %149 {offsets = [0, 32], sizes = [2, 32], strides = [1, 1]} : vector<2x128xf32> to vector<2x32xf32>
    %153 = vector.extract_strided_slice %150 {offsets = [0, 64], sizes = [2, 32], strides = [1, 1]} : vector<2x128xf32> to vector<2x32xf32>
    %154 = vector.extract_strided_slice %149 {offsets = [0, 96], sizes = [2, 32], strides = [1, 1]} : vector<2x128xf32> to vector<2x32xf32>
    %155 = arith.mulf %152, %138 : vector<2x32xf32>
    %156 = arith.mulf %151, %153 : vector<2x32xf32>
    %157 = arith.addf %155, %156 : vector<2x32xf32>
    %158 = math.tanh %157 : vector<2x32xf32>
    %159 = arith.mulf %154, %158 : vector<2x32xf32>
    %c5_i32 = arith.constant 5 : i32
    %160 = vector.broadcast %c5_i32 : i32 to vector<2x1xi32>
    %161 = arith.cmpi sgt, %8, %160 : vector<2x1xi32>
    %162 = vector.shape_cast %161 : vector<2x1xi1> to vector<2x1xi1>
    %163 = vector.broadcast %162 : vector<2x1xi1> to vector<2x32xi1>
    %164 = arith.select %163, %157, %138 : vector<2x32xi1>, vector<2x32xf32>
    %165 = vector.shape_cast %161 : vector<2x1xi1> to vector<2x1xi1>
    %166 = vector.broadcast %165 : vector<2x1xi1> to vector<2x32xi1>
    %167 = arith.select %166, %159, %141 : vector<2x32xi1>, vector<2x32xf32>
    %168 = vector.extract_strided_slice %7 {offsets = [12, 0], sizes = [2, 128], strides = [1, 1]} : vector<16x128xf32> to vector<2x128xf32>
    %cst_21 = arith.constant dense<0.000000e+00> : vector<2x128xf32>
    %169 = tpu.matmul %167, %9, %cst_21 {dimension_numbers = #tpu.dot_dimension_numbers<[1], [0], [0], [1], [0, 0, 1, 1], [], []>} : vector<2x32xf32>, vector<32x128xf32>, vector<2x128xf32> -> vector<2x128xf32>
    %170 = arith.addf %168, %169 : vector<2x128xf32>
    %171 = arith.negf %170 : vector<2x128xf32>
    %172 = math.exp %171 : vector<2x128xf32>
    %cst_22 = arith.constant 1.000000e+00 : f32
    %173 = vector.broadcast %cst_22 : f32 to vector<2x128xf32>
    %174 = arith.addf %173, %172 : vector<2x128xf32>
    %175 = arith.divf %173, %174 : vector<2x128xf32>
    %176 = math.tanh %170 : vector<2x128xf32>
    %177 = vector.extract_strided_slice %175 {offsets = [0, 0], sizes = [2, 32], strides = [1, 1]} : vector<2x128xf32> to vector<2x32xf32>
    %178 = vector.extract_strided_slice %175 {offsets = [0, 32], sizes = [2, 32], strides = [1, 1]} : vector<2x128xf32> to vector<2x32xf32>
    %179 = vector.extract_strided_slice %176 {offsets = [0, 64], sizes = [2, 32], strides = [1, 1]} : vector<2x128xf32> to vector<2x32xf32>
    %180 = vector.extract_strided_slice %175 {offsets = [0, 96], sizes = [2, 32], strides = [1, 1]} : vector<2x128xf32> to vector<2x32xf32>
    %181 = arith.mulf %178, %164 : vector<2x32xf32>
    %182 = arith.mulf %177, %179 : vector<2x32xf32>
    %183 = arith.addf %181, %182 : vector<2x32xf32>
    %184 = math.tanh %183 : vector<2x32xf32>
    %185 = arith.mulf %180, %184 : vector<2x32xf32>
    %c6_i32 = arith.constant 6 : i32
    %186 = vector.broadcast %c6_i32 : i32 to vector<2x1xi32>
    %187 = arith.cmpi sgt, %8, %186 : vector<2x1xi32>
    %188 = vector.shape_cast %187 : vector<2x1xi1> to vector<2x1xi1>
    %189 = vector.broadcast %188 : vector<2x1xi1> to vector<2x32xi1>
    %190 = arith.select %189, %183, %164 : vector<2x32xi1>, vector<2x32xf32>
    %191 = vector.shape_cast %187 : vector<2x1xi1> to vector<2x1xi1>
    %192 = vector.broadcast %191 : vector<2x1xi1> to vector<2x32xi1>
    %193 = arith.select %192, %185, %167 : vector<2x32xi1>, vector<2x32xf32>
    %194 = vector.extract_strided_slice %7 {offsets = [14, 0], sizes = [2, 128], strides = [1, 1]} : vector<16x128xf32> to vector<2x128xf32>
    %cst_23 = arith.constant dense<0.000000e+00> : vector<2x128xf32>
    %195 = tpu.matmul %193, %9, %cst_23 {dimension_numbers = #tpu.dot_dimension_numbers<[1], [0], [0], [1], [0, 0, 1, 1], [], []>} : vector<2x32xf32>, vector<32x128xf32>, vector<2x128xf32> -> vector<2x128xf32>
    %196 = arith.addf %194, %195 : vector<2x128xf32>
    %197 = arith.negf %196 : vector<2x128xf32>
    %198 = math.exp %197 : vector<2x128xf32>
    %cst_24 = arith.constant 1.000000e+00 : f32
    %199 = vector.broadcast %cst_24 : f32 to vector<2x128xf32>
    %200 = arith.addf %199, %198 : vector<2x128xf32>
    %201 = arith.divf %199, %200 : vector<2x128xf32>
    %202 = math.tanh %196 : vector<2x128xf32>
    %203 = vector.extract_strided_slice %201 {offsets = [0, 0], sizes = [2, 32], strides = [1, 1]} : vector<2x128xf32> to vector<2x32xf32>
    %204 = vector.extract_strided_slice %201 {offsets = [0, 32], sizes = [2, 32], strides = [1, 1]} : vector<2x128xf32> to vector<2x32xf32>
    %205 = vector.extract_strided_slice %202 {offsets = [0, 64], sizes = [2, 32], strides = [1, 1]} : vector<2x128xf32> to vector<2x32xf32>
    %206 = vector.extract_strided_slice %201 {offsets = [0, 96], sizes = [2, 32], strides = [1, 1]} : vector<2x128xf32> to vector<2x32xf32>
    %207 = arith.mulf %204, %190 : vector<2x32xf32>
    %208 = arith.mulf %203, %205 : vector<2x32xf32>
    %209 = arith.addf %207, %208 : vector<2x32xf32>
    %210 = math.tanh %209 : vector<2x32xf32>
    %211 = arith.mulf %206, %210 : vector<2x32xf32>
    %c7_i32 = arith.constant 7 : i32
    %212 = vector.broadcast %c7_i32 : i32 to vector<2x1xi32>
    %213 = arith.cmpi sgt, %8, %212 : vector<2x1xi32>
    %214 = vector.shape_cast %213 : vector<2x1xi1> to vector<2x1xi1>
    %215 = vector.broadcast %214 : vector<2x1xi1> to vector<2x32xi1>
    %216 = arith.select %215, %211, %193 : vector<2x32xi1>, vector<2x32xf32>
    %c0_25 = arith.constant 0 : index
    %c0_26 = arith.constant 0 : index
    %217 = vector.load %arg4[%c0_25, %c0_26] : memref<32x2xf32, #tpu.memory_space<vmem>>, vector<32x2xf32>
    %cst_27 = arith.constant dense<0.000000e+00> : vector<2x2xf32>
    %218 = tpu.matmul %216, %217, %cst_27 {dimension_numbers = #tpu.dot_dimension_numbers<[1], [0], [0], [1], [0, 0, 1, 1], [], []>} : vector<2x32xf32>, vector<32x2xf32>, vector<2x2xf32> -> vector<2x2xf32>
    %c0_28 = arith.constant 0 : index
    %c0_29 = arith.constant 0 : index
    %219 = vector.load %arg5[%c0_28, %c0_29] : memref<1x2xf32, #tpu.memory_space<vmem>>, vector<1x2xf32>
    %220 = vector.broadcast %219 : vector<1x2xf32> to vector<2x2xf32>
    %221 = arith.addf %218, %220 : vector<2x2xf32>
    %c0_30 = arith.constant 0 : index
    %c0_31 = arith.constant 0 : index
    %222 = vector.load %arg6[%c0_30, %c0_31] : memref<2x2xf32, #tpu.memory_space<vmem>>, vector<2x2xf32>
    tpu.vector_store %arg6[%c0_30, %c0_31], %221 {strides = array<i32>} : memref<2x2xf32, #tpu.memory_space<vmem>>, vector<2x2xf32>,
    return
  }
}

</mosaic_0001>

<bundles_post_ra>
// kernel: tpu_custom_call.1
= control target key start
LH: loop header
LB: loop body
LE: loop exit
PB: predicated region body
PF: predicated region fallthrough
CT: control target
= control target key end

     0   :  { %v1466_v2 = vmov 0   ;;  %v1467_v3 = vmov 0.0   ;;  %s1739_s0 = inlined_call_operand.vmem [shape: s32[16,1], index: 0, kind: input, shape index: {}]   ;;  %s1740_s1 = inlined_call_operand.vmem [shape: s32[2,1], index: 1, kind: input, shape index: {}]   ;;  %s1741_s2 = inlined_call_operand.vmem [shape: f32[16,128], index: 2, kind: input, shape index: {}]   ;;  %s1742_s3 = inlined_call_operand.vmem [shape: f32[32,128], index: 3, kind: input, shape index: {}]   ;;  %s1743_s4 = inlined_call_operand.vmem [shape: f32[32,2], index: 4, kind: input, shape index: {}]   ;;  %s1744_s5 = inlined_call_operand.vmem [shape: f32[1,2], index: 5, kind: input, shape index: {}]   ;;  %s1745_s6 = inlined_call_operand.hbm [shape: f32[2,2], index: 6, kind: output, shape index: {}]  }
   0x1   :  { %v24_v0 = vld [vmem:[%s1739_s0] sm:$0xff]  ;;  %1378 = vset.pattern.permute.xlu0 %v1466_v2  ;;  %1272 = vmatprep.subr.mxu1 %v1467_v3  ;;  %v1521_v4 = vld [vmem:[%s1742_s3 + $0x18] sm:$0xff]  ;;  %v1526_v5 = vld [vmem:[%s1742_s3 + $0x10] sm:$0xff] }
   0x2   :  { %v1514_v1 = vld [vmem:[%s1740_s1] sm:$0x3]  ;;  %v41_v6 = vld [vmem:[%s1741_s2 + $0x8] sm:$0xff]  ;;  %29 = vperm.xlu0 %1378, %v24_v0   ;;  %1273 = vmatpush3.msra.mxu1 %v1521_v4 }
   0x3   :  { %v40_v7 = vld [vmem:[%s1741_s2] sm:$0xff]  ;;  %v25_v8 = vld [vmem:[%s1739_s0 + $0x8] sm:$0xff]  ;;  %1274 = vmatprep.subr.mxu1 %v1467_v3  ;;  %1265 = vmatprep.subr.mxu0 %v41_v6 }
   0x4   :  { %v1542_v9 = vld [vmem:[%s1742_s3 + $0x8] sm:$0xff] }
   0x5   :  { %11 = vsyncpa [#allocation3], 0  ;;  %vm228_vm0 = vcmp.gt.s32.totalorder %v1514_v1, 0  ;;  %1275 = vmatpush3.msra.mxu1 %v1526_v5  ;;  %1266 = vmatpush3.msra.mxu0 %v41_v6  ;;  %v1550_v10 = vld [vmem:[%s1742_s3] sm:$0xff]  ;;  %vm1468_vm1 = vmmov 0   ;;  %v26_v12 = vlaneseq  ;;  %vm42_vm2 = vcmask 130048  }
   0x6   :  { %1276 = vmatprep.subr.mxu1 %v1467_v3  ;;  %1267 = vmatprep.subr.mxu0 %v40_v7  ;;  %v229_v11 = vsel %vm228_vm0, 1, %v1466_v2  ;;  %s1469_s0 = smov 64   ;;  %s1470_s3 = smov 32   ;;  %vm129_vm6 = vcmask 261120   ;;  %vm342_vm7 = vcmp.gt.s32.totalorder %v1514_v1, 1  ;;  %vm470_vm9 = vcmp.gt.s32.totalorder %v1514_v1, 2 }
   0x7   :  { %32 = vperm.xlu0 %1378, %v25_v8   ;;  %1277 = vmatpush3.msra.mxu1 %v1542_v9  ;;  %v27_v13 = vand.u32 127, %v26_v12  ;;  %v343_v50 = vsel %vm342_vm7, 1, %v1466_v2  ;;  %s1471_s13 = smov 96   ;;  %vm594_vm11 = vcmp.gt.s32.totalorder %v1514_v1, 3  ;;  %vm714_vm13 = vcmp.gt.s32.totalorder %v1514_v1, 4  ;;  %s1472_s24 = smov [#allocation2]  }
   0x8   :  { %1278 = vmatprep.subr.mxu1 %v1467_v3  ;;  %1268 = vmatpush3.msra.mxu0 %v40_v7  ;;  %vm831_vm15 = vcmp.gt.s32.totalorder %v1514_v1, 5  ;;  %s1187_s25 = sshll.u32 %s1472_s24, 4  ;;  %s1188_s25 = int_to_ptr.vmem [resolvable:$true] %s1187_s25 }
   0x9   :  { %1279 = vmatpush3.msra.mxu1 %v1550_v10  ;;  %1280 = vmatprep.mubr.msk.f32.mxu1 %vm1468_vm1, %v1467_v3  ;;  %p1449_p1 = scmp.lt.s32.totalorder %s1188_s25, %s1188_s25 }
   0xa   :  { %1281 = vmatmul.mubr.f32.vlgmr.msra.gmra.mxu1 %v1467_v3  ;;  %1283 = vmatprep.subr.mxu0 %v1467_v3 }
   0xb   :  { %231 = vperm.xlu0 %1378, %v229_v11   ;;  %1294 = vmatprep.subr.mxu1 %v1467_v3 }
   0xc   :  { %1295 = vmatpush3.msra.mxu1 %v1521_v4  ;;  %1302 = vmatprep.mubr.msk.f32.mxu1 %vm1468_vm1, %v1467_v3 }
   0xd   :  { %1296 = vmatprep.subr.mxu1 %v1467_v3  ;;  %1379 = vset.pattern.permute.xlu1 %v1466_v2 }
   0xe   :  { %1297 = vmatpush3.msra.mxu1 %v1526_v5 }
   0xf   :  { %1298 = vmatprep.subr.mxu1 %v1467_v3 }
  0x10   :  { %1299 = vmatpush3.msra.mxu1 %v1542_v9 }
  0x11   :  { %1300 = vmatprep.subr.mxu1 %v1467_v3 }
  0x12   :  { %1301 = vmatpush3.msra.mxu1 %v1550_v10 }
  0x13   :  { %1316 = vmatprep.subr.mxu1 %v1467_v3 }
  0x7d   :  { %v30_v14 = vpop.permute.xlu0 %29 }
  0x7e   :  { %vm34_vm3 = vcmp.eq.s32.totalorder %v27_v13, %v30_v14 }
  0x7f   :  { %v1195_v15 = vsel %vm34_vm3, 1.0, %v1467_v3  ;;  %vm1083_vm3 = vcmp.gt.s32.totalorder %v1514_v1, 7 }
  0x80   :  { %1269 = vmatprep.mubr.msk.f32.mxu0 %vm42_vm2, %v1195_v15 }
  0x82   :  { %v33_v16 = vpop.permute.xlu0 %32 }
  0x83   :  { %vm35_vm4 = vcmp.eq.s32.totalorder %v27_v13, %v33_v16 }
  0x84   :  { %v1196_v17 = vsel %vm35_vm4, 1.0, %v1467_v3 }
  0x85   :  { %1270 = vmatmul.mubr.msk.f32.vlgmr.msra.gmra.mxu0 %vm42_vm2, %v1196_v17 }
  0x86   :  { %1284 = vmatpush3.msra.mxu0 %v1521_v4  ;;  %1291 = vmatprep.mubr.msk.f32.mxu0 %vm1468_vm1, %v1467_v3  ;;  %v232_v34 = vpop.permute.xlu0 %231 }
  0x87   :  { %1285 = vmatprep.subr.mxu0 %v1467_v3  ;;  %vm233_vm5 = vcmp.eq.s32.totalorder %v232_v34, 1 }
  0x88   :  { %1286 = vmatpush3.msra.mxu0 %v1526_v5 }
  0x89   :  { %1287 = vmatprep.subr.mxu0 %v1467_v3 }
  0x8a   :  { %1288 = vmatpush3.msra.mxu0 %v1542_v9 }
  0x8b   :  { %1289 = vmatprep.subr.mxu0 %v1467_v3 }
  0x8c   :  { %1290 = vmatpush3.msra.mxu0 %v1550_v10 }
  0x8d   :  { %1305 = vmatprep.subr.mxu0 %v1467_v3 }
  0xca   :  { %v199_v18 = vpop.f32.mrf.mxu1 }
  0xcc   :  { %v1282_v19 = vpop.f32.mrf.mxu1 }
 0x145   :  { %v1584_v20 = vpop.f32.mrf.mxu0 }
 0x147   :  { %v1586_v21 = vpop.f32.mrf.mxu0 }
 0x148   :  { %v203_v22 = vadd.f32 %v199_v18, %v1586_v21 }
 0x14a   :  { %1380 = vtanh.f32 %v203_v22  ;;  %v1199_v24 = vmul.f32 -1.442695, %v203_v22 }
 0x14c   :  { %1382 = vpow2.f32 %v1199_v24  ;;  %v471_v24 = vsel %vm470_vm9, 1, %v1466_v2 }
 0x157   :  { %v1381_v23 = vpop.eup %1380 }
 0x158   :  { %213 = vrot.lane.b32.xlu1 %v1381_v23, %s1469_s0 }
 0x159   :  { %v1383_v25 = vpop.eup %1382 }
 0x15a   :  { %v207_v26 = vadd.f32 1.0, %v1383_v25 }
 0x15c   :  { %1384 = vrcp.f32 %v207_v26 }
 0x169   :  { %v1385_v27 = vpop.eup %1384 }
 0x16a   :  { %v211_v30 = vmul.f32 0.0, %v1385_v27 }
 0x1ca   :  { %v214_v28 = vpop.permute.xlu1 %213 }
 0x1cb   :  { %v216_v29 = vmul.f32 %v1385_v27, %v214_v28 }
 0x1cd   :  { %218 = vrot.lane.b32.xlu1 %v216_v29, %s1470_s3 }
 0x23f   :  { %v219_v31 = vpop.permute.xlu1 %218 }
 0x240   :  { %v221_v32 = vadd.f32 %v219_v31, %v211_v30 }
 0x242   :  { %1386 = vtanh.f32 %v221_v32  ;;  %v234_v51 = vsel %vm233_vm5, %v221_v32, 0.0 }
 0x243   :  { %v323_v52 = vrot.slane %v234_v51, 6 }
 0x24f   :  { %v1387_v33 = vpop.eup %1386 }
 0x250   :  { %224 = vrot.lane.b32.xlu1 %v1387_v33, %s1469_s0 }
 0x2c2   :  { %v225_v35 = vpop.permute.xlu1 %224 }
 0x2c3   :  { %v227_v36 = vmul.f32 %v1385_v27, %v225_v35 }
 0x2c5   :  { %v235_v37 = vsel %vm233_vm5, %v227_v36, 0.0  ;;  %vm1179_vm5 = vcmask 9216  }
 0x2c6   :  { %237 = vrot.lane.b32.xlu0 %v235_v37, %s1470_s3 }
 0x338   :  { %v238_v38 = vpop.permute.xlu0 %237 }
 0x339   :  { %1292 = vmatmul.mubr.msk.f32.vlgmr.msra.gmra.mxu0 %vm129_vm6, %v238_v38 }
 0x33a   :  { %1306 = vmatpush3.msra.mxu0 %v1521_v4  ;;  %1313 = vmatprep.mubr.msk.f32.mxu0 %vm1468_vm1, %v1467_v3 }
 0x33b   :  { %1307 = vmatprep.subr.mxu0 %v1467_v3 }
 0x33c   :  { %1308 = vmatpush3.msra.mxu0 %v1526_v5 }
 0x33d   :  { %1309 = vmatprep.subr.mxu0 %v1467_v3 }
 0x33e   :  { %1310 = vmatpush3.msra.mxu0 %v1542_v9 }
 0x33f   :  { %1311 = vmatprep.subr.mxu0 %v1467_v3 }
 0x340   :  { %1312 = vmatpush3.msra.mxu0 %v1550_v10 }
 0x341   :  { %1327 = vmatprep.subr.mxu0 %v1467_v3 }
 0x3f9   :  { %v307_v39 = vpop.f32.mrf.mxu0 }
 0x3fa   :  { %v312_v40 = vrot.slane %v307_v39, 6 }
 0x3fb   :  { %v1293_v41 = vpop.f32.mrf.mxu0 }
 0x3fc   :  { %v314_v42 = vadd.f32 %v312_v40, %v1586_v21 }
 0x3fe   :  { %1388 = vtanh.f32 %v314_v42  ;;  %v1201_v44 = vmul.f32 -1.442695, %v314_v42 }
 0x400   :  { %1390 = vpow2.f32 %v1201_v44 }
 0x40b   :  { %v1389_v43 = vpop.eup %1388 }
 0x40c   :  { %327 = vrot.lane.b32.xlu1 %v1389_v43, %s1469_s0 }
 0x40d   :  { %v1391_v45 = vpop.eup %1390 }
 0x40e   :  { %v318_v46 = vadd.f32 1.0, %v1391_v45 }
 0x410   :  { %1392 = vrcp.f32 %v318_v46 }
 0x41d   :  { %v1393_v47 = vpop.eup %1392 }
 0x41e   :  { %v325_v53 = vmul.f32 %v1393_v47, %v323_v52 }
 0x47e   :  { %v328_v48 = vpop.permute.xlu1 %327 }
 0x47f   :  { %v330_v49 = vmul.f32 %v1393_v47, %v328_v48 }
 0x481   :  { %332 = vrot.lane.b32.xlu0 %v330_v49, %s1470_s3 }
 0x485   :  { %345 = vperm.xlu0 %1378, %v343_v50  }
 0x4f3   :  { %v333_v54 = vpop.permute.xlu0 %332 }
 0x4f4   :  { %v335_v55 = vadd.f32 %v333_v54, %v325_v53 }
 0x4f6   :  { %1394 = vtanh.f32 %v335_v55  ;;  %v349_v56 = vrot.slane %v335_v55, 2 }
 0x4f8   :  { %350 = vrot.lane.b32.xlu0 %v349_v56, %s1471_s13 }
 0x500   :  { %v346_v61 = vpop.permute.xlu0 %345 }
 0x501   :  { %vm347_vm8 = vcmp.eq.s32.totalorder %v346_v61, 1 }
 0x503   :  { %v1395_v57 = vpop.eup %1394 }
 0x504   :  { %338 = vrot.lane.b32.xlu1 %v1395_v57, %s1469_s0 }
 0x56a   :  { %v351_v0 = vpop.permute.xlu0 %350 }
 0x576   :  { %v339_v58 = vpop.permute.xlu1 %338 }
 0x577   :  { %v341_v59 = vmul.f32 %v1393_v47, %v339_v58 }
 0x579   :  { %v358_v60 = vrot.slane %v341_v59, 2 }
 0x57b   :  { %359 = vrot.lane.b32.xlu1 %v358_v60, %s1470_s3  ;;  %v715_v60 = vsel %vm714_vm13, 1, %v1466_v2 }
 0x57f   :  { %353 = vrot.lane.b32.xlu1 %v234_v51, %s1471_s13  ;;  %v595_v51 = vsel %vm594_vm11, 1, %v1466_v2 }
 0x5ed   :  { %v360_v62 = vpop.permute.xlu1 %359 }
 0x5ee   :  { %v363_v63 = vsel %vm347_vm8, %v360_v62, %v238_v38 }
 0x5ef   :  { %1303 = vmatmul.mubr.msk.f32.vlgmr.msra.gmra.mxu1 %vm129_vm6, %v363_v63 }
 0x5f0   :  { %1317 = vmatpush3.msra.mxu1 %v1521_v4  ;;  %1324 = vmatprep.mubr.msk.f32.mxu1 %vm1468_vm1, %v1467_v3 }
 0x5f1   :  { %v354_v6 = vpop.permute.xlu1 %353  ;;  %1318 = vmatprep.subr.mxu1 %v1467_v3 }
 0x5f2   :  { %v356_v7 = vsel %vm347_vm8, %v351_v0, %v354_v6  ;;  %1319 = vmatpush3.msra.mxu1 %v1526_v5 }
 0x5f3   :  { %v449_v8 = vrot.slane %v356_v7, 4  ;;  %1320 = vmatprep.subr.mxu1 %v1467_v3 }
 0x5f4   :  { %1321 = vmatpush3.msra.mxu1 %v1542_v9 }
 0x5f5   :  { %450 = vrot.lane.b32.xlu1 %v449_v8, %s1470_s3  ;;  %1322 = vmatprep.subr.mxu1 %v1467_v3 }
 0x5f6   :  { %1323 = vmatpush3.msra.mxu1 %v1550_v10 }
 0x5f7   :  { %1338 = vmatprep.subr.mxu1 %v1467_v3 }
 0x667   :  { %v451_v25 = vpop.permute.xlu1 %450 }
 0x6af   :  { %v433_v11 = vpop.f32.mrf.mxu1 }
 0x6b0   :  { %v438_v12 = vrot.slane %v433_v11, 4 }
 0x6b1   :  { %v1304_v13 = vpop.f32.mrf.mxu1 }
 0x6b2   :  { %v440_v14 = vadd.f32 %v438_v12, %v1586_v21 }
 0x6b4   :  { %1396 = vtanh.f32 %v440_v14  ;;  %v1203_v16 = vmul.f32 -1.442695, %v440_v14 }
 0x6b6   :  { %1398 = vpow2.f32 %v1203_v16 }
 0x6c1   :  { %v1397_v15 = vpop.eup %1396 }
 0x6c2   :  { %455 = vrot.lane.b32.xlu0 %v1397_v15, %s1469_s0 }
 0x6c3   :  { %v1399_v17 = vpop.eup %1398 }
 0x6c4   :  { %v444_v18 = vadd.f32 1.0, %v1399_v17 }
 0x6c6   :  { %1400 = vrcp.f32 %v444_v18 }
 0x6d3   :  { %v1401_v19 = vpop.eup %1400 }
 0x6d4   :  { %v453_v26 = vmul.f32 %v1401_v19, %v451_v25 }
 0x734   :  { %v456_v22 = vpop.permute.xlu0 %455 }
 0x735   :  { %v458_v23 = vmul.f32 %v1401_v19, %v456_v22 }
 0x737   :  { %460 = vrot.lane.b32.xlu0 %v458_v23, %s1470_s3 }
 0x73b   :  { %473 = vperm.xlu0 %1378, %v471_v24  }
 0x7a9   :  { %v461_v27 = vpop.permute.xlu0 %460 }
 0x7aa   :  { %v463_v28 = vadd.f32 %v461_v27, %v453_v26 }
 0x7ac   :  { %1402 = vtanh.f32 %v463_v28  ;;  %v477_v29 = vrot.slane %v463_v28, 4 }
 0x7ae   :  { %478 = vrot.lane.b32.xlu0 %v477_v29, %s1471_s13 }
 0x7b6   :  { %v474_v31 = vpop.permute.xlu0 %473 }
 0x7b7   :  { %vm475_vm10 = vcmp.eq.s32.totalorder %v474_v31, 1 }
 0x7b9   :  { %v1403_v30 = vpop.eup %1402 }
 0x7ba   :  { %466 = vrot.lane.b32.xlu1 %v1403_v30, %s1469_s0 }
 0x820   :  { %v479_v32 = vpop.permute.xlu0 %478 }
 0x821   :  { %v481_v33 = vsel %vm475_vm10, %v479_v32, %v356_v7 }
 0x822   :  { %v573_v34 = vrot.slane %v481_v33, 2 }
 0x824   :  { %574 = vrot.lane.b32.xlu0 %v573_v34, %s1470_s3 }
 0x82c   :  { %v467_v35 = vpop.permute.xlu1 %466 }
 0x82d   :  { %v469_v36 = vmul.f32 %v1401_v19, %v467_v35 }
 0x82f   :  { %v483_v37 = vrot.slane %v469_v36, 4 }
 0x831   :  { %484 = vrot.lane.b32.xlu1 %v483_v37, %s1470_s3 }
 0x8a3   :  { %v485_v38 = vpop.permute.xlu1 %484 }
 0x8a4   :  { %v487_v39 = vsel %vm475_vm10, %v485_v38, %v363_v63 }
 0x8a5   :  { %1314 = vmatmul.mubr.msk.f32.vlgmr.msra.gmra.mxu0 %vm129_vm6, %v487_v39 }
 0x8a6   :  { %1328 = vmatpush3.msra.mxu0 %v1521_v4  ;;  %1335 = vmatprep.mubr.msk.f32.mxu0 %vm1468_vm1, %v1467_v3 }
 0x8a7   :  { %1329 = vmatprep.subr.mxu0 %v1467_v3 }
 0x8a8   :  { %1330 = vmatpush3.msra.mxu0 %v1526_v5 }
 0x8a9   :  { %1331 = vmatprep.subr.mxu0 %v1467_v3 }
 0x8aa   :  { %1332 = vmatpush3.msra.mxu0 %v1542_v9 }
 0x8ab   :  { %1333 = vmatprep.subr.mxu0 %v1467_v3 }
 0x8ac   :  { %1334 = vmatpush3.msra.mxu0 %v1550_v10 }
 0x8ad   :  { %1349 = vmatprep.subr.mxu0 %v1467_v3 }
 0x965   :  { %v557_v40 = vpop.f32.mrf.mxu0 }
 0x966   :  { %v562_v41 = vrot.slane %v557_v40, 2 }
 0x967   :  { %v1315_v42 = vpop.f32.mrf.mxu0 }
 0x968   :  { %v564_v43 = vadd.f32 %v562_v41, %v1586_v21  ;;  %v575_v21 = vpop.permute.xlu0 %574 }
 0x96a   :  { %1404 = vtanh.f32 %v564_v43  ;;  %v1205_v45 = vmul.f32 -1.442695, %v564_v43 }
 0x96c   :  { %1406 = vpow2.f32 %v1205_v45 }
 0x977   :  { %v1405_v44 = vpop.eup %1404 }
 0x978   :  { %579 = vrot.lane.b32.xlu1 %v1405_v44, %s1469_s0 }
 0x979   :  { %v1407_v46 = vpop.eup %1406 }
 0x97a   :  { %v568_v47 = vadd.f32 1.0, %v1407_v46 }
 0x97c   :  { %1408 = vrcp.f32 %v568_v47 }
 0x989   :  { %v1409_v48 = vpop.eup %1408 }
 0x98a   :  { %v577_v52 = vmul.f32 %v1409_v48, %v575_v21 }
 0x9ea   :  { %v580_v49 = vpop.permute.xlu1 %579 }
 0x9eb   :  { %v582_v50 = vmul.f32 %v1409_v48, %v580_v49 }
 0x9ed   :  { %584 = vrot.lane.b32.xlu1 %v582_v50, %s1470_s3 }
 0x9f1   :  { %597 = vperm.xlu1 %1379, %v595_v51  }
 0xa5f   :  { %v585_v53 = vpop.permute.xlu1 %584 }
 0xa60   :  { %v587_v54 = vadd.f32 %v585_v53, %v577_v52 }
 0xa62   :  { %1410 = vtanh.f32 %v587_v54  ;;  %v601_v55 = vrot.slane %v587_v54, 6 }
 0xa64   :  { %602 = vrot.lane.b32.xlu1 %v601_v55, %s1471_s13 }
 0xa6c   :  { %v598_v57 = vpop.permute.xlu1 %597 }
 0xa6d   :  { %vm599_vm12 = vcmp.eq.s32.totalorder %v598_v57, 1 }
 0xa6f   :  { %v1411_v56 = vpop.eup %1410 }
 0xa70   :  { %590 = vrot.lane.b32.xlu0 %v1411_v56, %s1469_s0 }
 0xad6   :  { %v603_v58 = vpop.permute.xlu1 %602 }
 0xad7   :  { %v605_v59 = vsel %vm599_vm12, %v603_v58, %v481_v33 }
 0xad8   :  { %694 = vrot.lane.b32.xlu1 %v605_v59, %s1470_s3 }
 0xadc   :  { %717 = vperm.xlu1 %1379, %v715_v60  }
 0xae2   :  { %v591_v61 = vpop.permute.xlu0 %590 }
 0xae3   :  { %v593_v62 = vmul.f32 %v1409_v48, %v591_v61 }
 0xae5   :  { %v607_v63 = vrot.slane %v593_v62, 6 }
 0xae7   :  { %608 = vrot.lane.b32.xlu0 %v607_v63, %s1470_s3 }
 0xb4a   :  { %v695_v19 = vpop.permute.xlu1 %694 }
 0xb57   :  { %v718_v26 = vpop.permute.xlu1 %717 }
 0xb58   :  { %vm719_vm14 = vcmp.eq.s32.totalorder %v718_v26, 1 }
 0xb59   :  { %v609_v0 = vpop.permute.xlu0 %608 }
 0xb5a   :  { %v611_v6 = vsel %vm599_vm12, %v609_v0, %v487_v39 }
 0xb5b   :  { %721 = vrot.lane.b32.xlu1 %v611_v6, %s1471_s13  ;;  %1325 = vmatmul.mubr.msk.f32.vlgmr.msra.gmra.mxu1 %vm129_vm6, %v611_v6 }
 0xb5c   :  { %1339 = vmatpush3.msra.mxu1 %v1521_v4  ;;  %1346 = vmatprep.mubr.msk.f32.mxu1 %vm1468_vm1, %v1467_v3 }
 0xb5d   :  { %1340 = vmatprep.subr.mxu1 %v1467_v3 }
 0xb5e   :  { %1341 = vmatpush3.msra.mxu1 %v1526_v5 }
 0xb5f   :  { %1342 = vmatprep.subr.mxu1 %v1467_v3 }
 0xb60   :  { %1343 = vmatpush3.msra.mxu1 %v1542_v9 }
 0xb61   :  { %1344 = vmatprep.subr.mxu1 %v1467_v3 }
 0xb62   :  { %1345 = vmatpush3.msra.mxu1 %v1550_v10 }
 0xb63   :  { %1360 = vmatprep.subr.mxu1 %v1467_v3 }
 0xbcd   :  { %v722_v29 = vpop.permute.xlu1 %721 }
 0xc1b   :  { %v681_v7 = vpop.f32.mrf.mxu1 }
 0xc1c   :  { %v685_v8 = vadd.f32 %v1584_v20, %v681_v7 }
 0xc1d   :  { %v1326_v11 = vpop.f32.mrf.mxu1 }
 0xc1e   :  { %1412 = vtanh.f32 %v685_v8  ;;  %v1207_v13 = vmul.f32 -1.442695, %v685_v8 }
 0xc20   :  { %1414 = vpow2.f32 %v1207_v13 }
 0xc2b   :  { %v1413_v12 = vpop.eup %1412 }
 0xc2c   :  { %699 = vrot.lane.b32.xlu0 %v1413_v12, %s1469_s0 }
 0xc2d   :  { %v1415_v14 = vpop.eup %1414 }
 0xc2e   :  { %v689_v15 = vadd.f32 1.0, %v1415_v14 }
 0xc30   :  { %1416 = vrcp.f32 %v689_v15 }
 0xc3d   :  { %v1417_v16 = vpop.eup %1416 }
 0xc3e   :  { %v697_v22 = vmul.f32 %v1417_v16, %v695_v19 }
 0xc9e   :  { %v700_v17 = vpop.permute.xlu0 %699 }
 0xc9f   :  { %v702_v18 = vmul.f32 %v1417_v16, %v700_v17 }
 0xca1   :  { %704 = vrot.lane.b32.xlu0 %v702_v18, %s1470_s3 }
 0xd13   :  { %v705_v23 = vpop.permute.xlu0 %704 }
 0xd14   :  { %v707_v24 = vadd.f32 %v705_v23, %v697_v22 }
 0xd16   :  { %1418 = vtanh.f32 %v707_v24  ;;  %v720_v40 = vsel %vm719_vm14, %v707_v24, %v695_v19 }
 0xd17   :  { %v812_v41 = vrot.slane %v720_v40, 6 }
 0xd23   :  { %v1419_v25 = vpop.eup %1418 }
 0xd24   :  { %710 = vrot.lane.b32.xlu0 %v1419_v25, %s1469_s0 }
 0xd96   :  { %v711_v27 = vpop.permute.xlu0 %710 }
 0xd97   :  { %v713_v28 = vmul.f32 %v1417_v16, %v711_v27 }
 0xd99   :  { %v724_v30 = vsel %vm719_vm14, %v713_v28, %v722_v29 }
 0xd9a   :  { %726 = vrot.lane.b32.xlu0 %v724_v30, %s1470_s3 }
 0xe0c   :  { %v727_v31 = vpop.permute.xlu0 %726 }
 0xe0d   :  { %1336 = vmatmul.mubr.msk.f32.vlgmr.msra.gmra.mxu0 %vm129_vm6, %v727_v31 }
 0xe0e   :  { %1350 = vmatpush3.msra.mxu0 %v1521_v4  ;;  %1357 = vmatprep.mubr.msk.f32.mxu0 %vm1468_vm1, %v1467_v3 }
 0xe0f   :  { %1351 = vmatprep.subr.mxu0 %v1467_v3 }
 0xe10   :  { %1352 = vmatpush3.msra.mxu0 %v1526_v5 }
 0xe11   :  { %1353 = vmatprep.subr.mxu0 %v1467_v3 }
 0xe12   :  { %1354 = vmatpush3.msra.mxu0 %v1542_v9 }
 0xe13   :  { %1355 = vmatprep.subr.mxu0 %v1467_v3 }
 0xe14   :  { %1356 = vmatpush3.msra.mxu0 %v1550_v10  ;;  %v832_v10 = vsel %vm831_vm15, 1, %v1466_v2 }
 0xecd   :  { %v796_v32 = vpop.f32.mrf.mxu0 }
 0xece   :  { %v801_v33 = vrot.slane %v796_v32, 6 }
 0xecf   :  { %v1337_v34 = vpop.f32.mrf.mxu0 }
 0xed0   :  { %v803_v4 = vadd.f32 %v1584_v20, %v801_v33 }
 0xed2   :  { %1420 = vtanh.f32 %v803_v4  ;;  %v1209_v36 = vmul.f32 -1.442695, %v803_v4 }
 0xed4   :  { %1422 = vpow2.f32 %v1209_v36 }
 0xedf   :  { %v1421_v35 = vpop.eup %1420 }
 0xee0   :  { %816 = vrot.lane.b32.xlu1 %v1421_v35, %s1469_s0 }
 0xee1   :  { %v1423_v5 = vpop.eup %1422 }
 0xee2   :  { %v807_v37 = vadd.f32 1.0, %v1423_v5 }
 0xee4   :  { %1424 = vrcp.f32 %v807_v37  ;;  %v1084_v37 = vsel %vm1083_vm3, 1, %v1466_v2 }
 0xef1   :  { %v1425_v38 = vpop.eup %1424 }
 0xef2   :  { %v814_v42 = vmul.f32 %v1425_v38, %v812_v41  ;;  %v1095_v41 = vld [vmem:[%s1743_s4] sm:$0xff] }
 0xf52   :  { %v817_v9 = vpop.permute.xlu1 %816 }
 0xf53   :  { %v819_v39 = vmul.f32 %v1425_v38, %v817_v9 }
 0xf55   :  { %821 = vrot.lane.b32.xlu0 %v819_v39, %s1470_s3 }
 0xf59   :  { %834 = vperm.xlu0 %1378, %v832_v10   ;;  %v1098_v10 = vld [vmem:[%s1743_s4 + $0x18] sm:$0xff] }
 0xfc7   :  { %v822_v43 = vpop.permute.xlu0 %821 }
 0xfc8   :  { %v824_v44 = vadd.f32 %v822_v43, %v814_v42 }
 0xfca   :  { %1426 = vtanh.f32 %v824_v44  ;;  %v838_v45 = vrot.slane %v824_v44, 2 }
 0xfcc   :  { %839 = vrot.lane.b32.xlu0 %v838_v45, %s1471_s13 }
 0xfd4   :  { %v835_v50 = vpop.permute.xlu0 %834 }
 0xfd5   :  { %vm836_vm0 = vcmp.eq.s32.totalorder %v835_v50, 1 }
 0xfd7   :  { %v1427_v46 = vpop.eup %1426 }
 0xfd8   :  { %827 = vrot.lane.b32.xlu1 %v1427_v46, %s1469_s0 }
0x103e   :  { %v840_v52 = vpop.permute.xlu0 %839 }
0x104a   :  { %v828_v47 = vpop.permute.xlu1 %827 }
0x104b   :  { %v830_v48 = vmul.f32 %v1425_v38, %v828_v47 }
0x104d   :  { %v847_v49 = vrot.slane %v830_v48, 2 }
0x104f   :  { %848 = vrot.lane.b32.xlu1 %v847_v49, %s1470_s3 }
0x1053   :  { %842 = vrot.lane.b32.xlu1 %v720_v40, %s1471_s13  ;;  %v1097_v40 = vld [vmem:[%s1743_s4 + $0x10] sm:$0xff] }
0x10c1   :  { %v849_v51 = vpop.permute.xlu1 %848 }
0x10c2   :  { %v852_v21 = vsel %vm836_vm0, %v849_v51, %v727_v31 }
0x10c3   :  { %1347 = vmatmul.mubr.msk.f32.vlgmr.msra.gmra.mxu1 %vm129_vm6, %v852_v21 }
0x10c4   :  { %1368 = vmatprep.mubr.msk.f32.mxu1 %vm1468_vm1, %v1467_v3  ;;  %vm959_vm1 = vcmp.gt.s32.totalorder %v1514_v1, 6  ;;  %1361 = vmatpush3.msra.mxu1 %v1098_v10  ;;  %v1096_v1 = vld [vmem:[%s1743_s4 + $0x8] sm:$0xff]  ;;  %s1444_s4 = scalar_lea.vmem %s1188_s25, 32 }
0x10c5   :  { %v843_v53 = vpop.permute.xlu1 %842  ;;  %v960_v8 = vsel %vm959_vm1, 1, %v1466_v2  ;;  %1362 = vmatprep.subr.mxu1 %v1467_v3  ;;  %p1445_p0 = scmp.ne.s32.totalorder %s1188_s25, %s1444_s4  ;;  %p1450_p2 = scmp.lt.s32.totalorder %s1444_s4, %s1444_s4 }
0x10c6   :  { %v845_v54 = vsel %vm836_vm0, %v840_v52, %v843_v53  ;;  %1363 = vmatpush3.msra.mxu1 %v1097_v40 }
0x10c7   :  { %v938_v55 = vrot.slane %v845_v54, 4  ;;  %1364 = vmatprep.subr.mxu1 %v1467_v3  ;;  %p1451_p3 = por %p1450_p2, %p1449_p1 }
0x10c8   :  { %1365 = vmatpush3.msra.mxu1 %v1096_v1 }
0x10c9   :  { %939 = vrot.lane.b32.xlu1 %v938_v55, %s1470_s3  ;;  %1366 = vmatprep.subr.mxu1 %v1467_v3  ;;  %v1214_v3 = vld [vmem:[%s1744_s5] ss:$0 sm:$0xff]  ;;  %p1452_p4 = pnand %p1451_p3, %p1445_p0 }
0x10ca   :  { %1367 = vmatpush3.msra.mxu1 %v1095_v41 }
0x113b   :  { %v940_v11 = vpop.permute.xlu1 %939 }
0x1183   :  { %v922_v56 = vpop.f32.mrf.mxu1 }
0x1184   :  { %v927_v57 = vrot.slane %v922_v56, 4 }
0x1185   :  { %v1348_v58 = vpop.f32.mrf.mxu1 }
0x1186   :  { %v929_v59 = vadd.f32 %v1584_v20, %v927_v57 }
0x1188   :  { %1428 = vtanh.f32 %v929_v59  ;;  %v1211_v61 = vmul.f32 -1.442695, %v929_v59 }
0x118a   :  { %1430 = vpow2.f32 %v1211_v61 }
0x1195   :  { %v1429_v60 = vpop.eup %1428 }
0x1196   :  { %944 = vrot.lane.b32.xlu0 %v1429_v60, %s1469_s0 }
0x1197   :  { %v1431_v62 = vpop.eup %1430 }
0x1198   :  { %v933_v63 = vadd.f32 1.0, %v1431_v62 }
0x119a   :  { %1432 = vrcp.f32 %v933_v63 }
0x11a7   :  { %v1433_v0 = vpop.eup %1432 }
0x11a8   :  { %v942_v12 = vmul.f32 %v1433_v0, %v940_v11 }
0x1208   :  { %v945_v6 = vpop.permute.xlu0 %944 }
0x1209   :  { %v947_v7 = vmul.f32 %v1433_v0, %v945_v6 }
0x120b   :  { %949 = vrot.lane.b32.xlu0 %v947_v7, %s1470_s3 }
0x120f   :  { %962 = vperm.xlu0 %1378, %v960_v8  }
0x127d   :  { %v950_v13 = vpop.permute.xlu0 %949 }
0x127e   :  { %v952_v14 = vadd.f32 %v950_v13, %v942_v12 }
0x1280   :  { %1434 = vtanh.f32 %v952_v14  ;;  %v966_v15 = vrot.slane %v952_v14, 4 }
0x1282   :  { %967 = vrot.lane.b32.xlu0 %v966_v15, %s1471_s13 }
0x128a   :  { %v963_v17 = vpop.permute.xlu0 %962 }
0x128b   :  { %vm964_vm2 = vcmp.eq.s32.totalorder %v963_v17, 1 }
0x128d   :  { %v1435_v16 = vpop.eup %1434 }
0x128e   :  { %955 = vrot.lane.b32.xlu1 %v1435_v16, %s1469_s0 }
0x12f4   :  { %v968_v18 = vpop.permute.xlu0 %967 }
0x12f5   :  { %v970_v19 = vsel %vm964_vm2, %v968_v18, %v845_v54 }
0x12f6   :  { %v1062_v22 = vrot.slane %v970_v19, 2 }
0x12f8   :  { %1063 = vrot.lane.b32.xlu0 %v1062_v22, %s1470_s3 }
0x1300   :  { %v956_v23 = vpop.permute.xlu1 %955 }
0x1301   :  { %v958_v24 = vmul.f32 %v1433_v0, %v956_v23 }
0x1303   :  { %v972_v25 = vrot.slane %v958_v24, 4 }
0x1305   :  { %973 = vrot.lane.b32.xlu1 %v972_v25, %s1470_s3 }
0x1377   :  { %v974_v26 = vpop.permute.xlu1 %973 }
0x1378   :  { %v976_v27 = vsel %vm964_vm2, %v974_v26, %v852_v21 }
0x1379   :  { %1358 = vmatmul.mubr.msk.f32.vlgmr.msra.gmra.mxu0 %vm129_vm6, %v976_v27 }
0x1439   :  { %v1046_v28 = vpop.f32.mrf.mxu0 }
0x143a   :  { %v1051_v29 = vrot.slane %v1046_v28, 2 }
0x143b   :  { %v1359_v30 = vpop.f32.mrf.mxu0 }
0x143c   :  { %v1053_v31 = vadd.f32 %v1584_v20, %v1051_v29  ;;  %v1064_v20 = vpop.permute.xlu0 %1063 }
0x143e   :  { %1436 = vtanh.f32 %v1053_v31  ;;  %v1213_v33 = vmul.f32 -1.442695, %v1053_v31 }
0x1440   :  { %1438 = vpow2.f32 %v1213_v33 }
0x144b   :  { %v1437_v32 = vpop.eup %1436 }
0x144c   :  { %1068 = vrot.lane.b32.xlu1 %v1437_v32, %s1469_s0 }
0x144d   :  { %v1439_v34 = vpop.eup %1438 }
0x144e   :  { %v1057_v4 = vadd.f32 1.0, %v1439_v34 }
0x1450   :  { %1440 = vrcp.f32 %v1057_v4 }
0x145d   :  { %v1441_v35 = vpop.eup %1440 }
0x145e   :  { %v1066_v38 = vmul.f32 %v1441_v35, %v1064_v20 }
0x14be   :  { %v1069_v36 = vpop.permute.xlu1 %1068 }
0x14bf   :  { %v1071_v5 = vmul.f32 %v1441_v35, %v1069_v36 }
0x14c1   :  { %1073 = vrot.lane.b32.xlu1 %v1071_v5, %s1470_s3 }
0x14c5   :  { %1086 = vperm.xlu1 %1379, %v1084_v37  }
0x1533   :  { %v1074_v9 = vpop.permute.xlu1 %1073 }
0x1534   :  { %v1076_v39 = vadd.f32 %v1074_v9, %v1066_v38 }
0x1536   :  { %1442 = vtanh.f32 %v1076_v39 }
0x1540   :  { %v1087_v45 = vpop.permute.xlu1 %1086 }
0x1541   :  { %vm1088_vm4 = vcmp.eq.s32.totalorder %v1087_v45, 1 }
0x1543   :  { %v1443_v2 = vpop.eup %1442 }
0x1544   :  { %1079 = vrot.lane.b32.xlu0 %v1443_v2, %s1469_s0 }
0x15b6   :  { %v1080_v42 = vpop.permute.xlu0 %1079 }
0x15b7   :  { %v1082_v43 = vmul.f32 %v1441_v35, %v1080_v42 }
0x15b9   :  { %v1090_v44 = vrot.slane %v1082_v43, 6 }
0x15bb   :  { %1091 = vrot.lane.b32.xlu0 %v1090_v44, %s1470_s3 }
0x162d   :  { %v1092_v46 = vpop.permute.xlu0 %1091 }
0x162e   :  { %v1094_v47 = vsel %vm1088_vm4, %v1092_v46, %v976_v27 }
0x162f   :  { %1369 = vmatmul.mubr.msk.f32.vlgmr.msra.gmra.mxu1 %vm129_vm6, %v1094_v47 }
0x16ef   :  { %v1175_v48 = vpop.f32.mrf.mxu1 }
0x16f0   :  { %v1176_v49 = vadd.f32 %v1214_v3, %v1175_v48 }
0x16f1   :  { %v1370_v50 = vpop.f32.mrf.mxu1 }
0x16f2   :  { %1180 = vst.msk [vmem:[#allocation2] sm:$0x3] %vm1179_vm5, %v1176_v49 }
0x16f3   :  { %1455 = shalt.err (!%p1452_p4)
}
0x16f4   :  { %1190 = dma.vmem_to_hbm [thread:$0]  %s1188_s25, 32, %s1745_s6, [#allocation3]  }
0x16f5   :  { %1464 = dma.done.wait [#allocation3], 32  }
0x16f6   :  { %1465 = vsyncadd [#allocation3], 4294967264 }
0x16f7   :  { %1194 = vsyncpa [#allocation3], 1 }

</bundles_post_ra>
